<compile_context>
chip_gen: v7x
topology: tpu7x:2x2x1
jax: 0.10.0
libtpu: 0.0.40
codegen_flags: <defaults>
</compile_context>

<pallas_src>
import jax
import jax.numpy as jnp
from jax.experimental import pallas as pl
from jax.experimental.pallas import tpu as pltpu


def _conv1x1_kernel(x_ref, w_ref, b_ref, o_ref):
    # x_ref: (B_blk, C_in, t_hw)  activation slab, pixels on the lane axis
    # w_ref: (C_out, C_in)        full 1x1-conv weight
    # b_ref: (C_out, 1)           bias, broadcast over lanes
    # o_ref: (B_blk, C_out, t_hw) lane-dense output slab
    w = w_ref[...]
    b = b_ref[...]
    # Static (small) batch-block loop, unrolled at trace time.
    for i in range(x_ref.shape[0]):
        acc = jnp.dot(w, x_ref[i],
                      preferred_element_type=jnp.float32,
                      precision=jax.lax.Precision.HIGHEST)
        o_ref[i] = (acc + b).astype(o_ref.dtype)


def _round_down_128(v):
    return max(128, (int(v) // 128) * 128)


def _round_up_128(v):
    return ((int(v) + 127) // 128) * 128


def _select_tiling(N, C_in, C_out, HW, itemsize, t_hw_override=None,
                   target_bytes=3 << 20, vmem_budget_bytes=24 << 20):
    """Pick (batch_block, pixel_tile) sized for VMEM and per-step overhead."""
    # --- pixel tile: as fat as the byte budget allows, multiple of 128 ----
    if t_hw_override is not None:
        t_hw = HW if t_hw_override >= HW else _round_down_128(t_hw_override)
    else:
        t_hw = _round_down_128(target_bytes // max(itemsize * C_in, 1))
        if t_hw >= HW:
            t_hw = HW          # full extent: legal even if HW % 128 != 0

    # --- batch blocking for small feature maps (amortize step overhead) ---
    b_blk = 1
    if t_hw == HW:
        per_image = HW * C_in * itemsize
        b_want = int(max(1, target_bytes // max(per_image, 1)))
        for d in range(min(N, b_want), 0, -1):
            if N % d == 0:          # exact blocks only
                b_blk = d
                break

    # --- guarantee >= 2 parallel grid steps (v7x dual TC / megacore) ------
    def n_steps(b, t):
        return (N // b) * (-(-HW // t))

    if n_steps(b_blk, t_hw) < 2:
        if b_blk > 1:
            for d in range(N // 2, 0, -1):
                if N % d == 0:
                    b_blk = d
                    break
        elif HW >= 256:
            t_hw = min(_round_up_128(-(-HW // 2)), _round_down_128(HW))

    # --- VMEM safety cap: double-buffered in+out must fit the budget ------
    while (2 * (C_in + C_out) * t_hw * b_blk * itemsize > vmem_budget_bytes
           and (t_hw > 128 or b_blk > 1)):
        if b_blk > 1:
            b_blk = 1
        else:
            t_hw = _round_down_128(t_hw // 2)

    return b_blk, t_hw


def class_head_forward(x_nchw, weight, bias, num_anchors=3, num_classes=2,
                       t_hw=None):
    """x_nchw: (N, C_in, H, W); weight: (C_out, C_in[,1,1]); bias: (C_out,).

    Returns (N, H*W*num_anchors, num_classes+1), matching ClassHead.forward.
    `t_hw` optionally overrides the auto pixel-tile (testing / tuning hook).
    """
    N, C_in, H, W = x_nchw.shape
    w2d = weight.reshape(weight.shape[0], C_in)      # (C_out, C_in)
    C_out = w2d.shape[0]
    assert C_out == num_anchors * (num_classes + 1)

    HW = H * W
    x_ncl = x_nchw.reshape(N, C_in, HW)              # metadata-only reshape
    b2d = bias.reshape(C_out, 1)

    itemsize = jnp.dtype(x_nchw.dtype).itemsize
    b_blk, tile_hw = _select_tiling(N, C_in, C_out, HW, itemsize,
                                    t_hw_override=t_hw)

    cost = pl.CostEstimate(
        flops=2 * N * HW * C_in * C_out,
        transcendentals=0,
        bytes_accessed=(N * HW * (C_in + C_out) + C_out * (C_in + 1)) * itemsize,
    )

    out_ncl = pl.pallas_call(
        _conv1x1_kernel,
        out_shape=jax.ShapeDtypeStruct((N, C_out, HW), x_nchw.dtype),
        grid_spec=pl.GridSpec(
            grid=(N // b_blk, pl.cdiv(HW, tile_hw)),
            in_specs=[
                pl.BlockSpec((b_blk, C_in, tile_hw), lambda n, j: (n, 0, j)),
                pl.BlockSpec((C_out, C_in), lambda n, j: (0, 0)),
                pl.BlockSpec((C_out, 1), lambda n, j: (0, 0)),
            ],
            out_specs=pl.BlockSpec((b_blk, C_out, tile_hw),
                                   lambda n, j: (n, 0, j)),
        ),
        compiler_params=pltpu.CompilerParams(
            dimension_semantics=("parallel", "parallel"),
            vmem_limit_bytes=32 * 1024 * 1024,
        ),
        cost_estimate=cost,
    )(x_ncl, w2d, b2d)

    # Tiny output (C_out = 9 channels) transpose + view, matching
    # permute(0, 2, 3, 1).view(N, -1, num_classes+1) exactly.
    # TODO(synk): if the downstream consumer (softmax / multi-level concat) can
    # work channel-major, or the sibling Bbox/Landmark heads are fused into one
    # concatenated-C_out kernel, defer/fuse this transpose there instead.
    out_nlc = jnp.transpose(out_ncl, (0, 2, 1))      # (N, HW, C_out)
    return out_nlc.reshape(N, HW * num_anchors, num_classes + 1)


def _reference(x, weight, bias, num_anchors=3, num_classes=2):
    N, C_in, H, W = x.shape
    C_out = weight.shape[0]
    w2d = weight.reshape(C_out, C_in)
    out = jnp.einsum("nchw,oc->nhwo", x, w2d,
                     precision=jax.lax.Precision.HIGHEST) + bias
    return out.reshape(N, H * W * num_anchors, num_classes + 1)


if __name__ == "__main__":
    num_anchors = 3
    num_classes = 2
    C_out = num_anchors * (num_classes + 1)          # 9
    key = jax.random.PRNGKey(0)
    kx, kw, kb, kx2, kx3 = jax.random.split(key, 5)

    # Synthetic Conv2d(C_in, 9, kernel_size=1) parameters.
    C_in = 32
    weight = jax.random.normal(kw, (C_out, C_in, 1, 1), dtype=jnp.float32) * 0.05
    bias = jax.random.normal(kb, (C_out,), dtype=jnp.float32) * 0.05

    # 1) Main example (N=2, HW=256): auto tiling, batch blocking + megacore split.
    x = jax.random.normal(kx, (2, C_in, 16, 16), dtype=jnp.float32)
    out = jax.block_until_ready(class_head_forward(x, weight, bias))
    ref = _reference(x, weight, bias)
    assert out.shape == (2, 16 * 16 * num_anchors, num_classes + 1)
    assert jnp.allclose(out, ref, atol=1e-4, rtol=1e-4)

    # 2) Partial-final-tile path: HW=225 (not a multiple of 128), forced 128 tiles.
    x2 = jax.random.normal(kx2, (2, C_in, 15, 15), dtype=jnp.float32)
    out2 = jax.block_until_ready(class_head_forward(x2, weight, bias, t_hw=128))
    ref2 = _reference(x2, weight, bias)
    assert jnp.allclose(out2, ref2, atol=1e-4, rtol=1e-4)

    # 3) Single image, HW=400: auto tiling must split HW (>=2 grid steps for the
    #    dual TensorCores) and handle the ragged final tile.
    x3 = jax.random.normal(kx3, (1, C_in, 20, 20), dtype=jnp.float32)
    out3 = jax.block_until_ready(class_head_forward(x3, weight, bias))
    ref3 = _reference(x3, weight, bias)
    assert jnp.allclose(out3, ref3, atol=1e-4, rtol=1e-4)

    print("KERNEL_OK")
</pallas_src>

<mosaic_0001>
module attributes {stable_mosaic.version = 11 : i64} {
  func.func @_conv1x1_kernel(%arg0: i32, %arg1: i32, %arg2: memref<1x32x256xf32, #tpu.memory_space<vmem>>, %arg3: memref<9x32xf32, #tpu.memory_space<vmem>>, %arg4: memref<9x1xf32, #tpu.memory_space<vmem>>, %arg5: memref<1x9x256xf32, #tpu.memory_space<vmem>>) attributes {dimension_semantics = [#tpu.dimension_semantics<parallel>, #tpu.dimension_semantics<parallel>], iteration_bounds = array<i64: 2, 1>, scalar_prefetch = 0 : i64, scratch_operands = 0 : i64, tpu.core_type = #tpu.core_type<tc>, window_params = [{transform_indices = @transform_0, window_bounds = array<i64: 1, 32, 256>}, {pipeline_mode = #tpu.pipeline_mode<synchronous>, transform_indices = @transform_1, window_bounds = array<i64: 9, 32>}, {pipeline_mode = #tpu.pipeline_mode<synchronous>, transform_indices = @transform_2, window_bounds = array<i64: 9, 1>}, {transform_indices = @transform_3, window_bounds = array<i64: 1, 9, 256>}]} {
    %c0 = arith.constant 0 : index
    %c0_0 = arith.constant 0 : index
    %0 = vector.load %arg3[%c0, %c0_0] : memref<9x32xf32, #tpu.memory_space<vmem>>, vector<9x32xf32>
    %c0_1 = arith.constant 0 : index
    %c0_2 = arith.constant 0 : index
    %1 = vector.load %arg4[%c0_1, %c0_2] : memref<9x1xf32, #tpu.memory_space<vmem>>, vector<9x1xf32>
    %c0_3 = arith.constant 0 : index
    %c0_4 = arith.constant 0 : index
    %c0_5 = arith.constant 0 : index
    %2 = vector.load %arg2[%c0_3, %c0_4, %c0_5] : memref<1x32x256xf32, #tpu.memory_space<vmem>>, vector<1x32x256xf32>
    %3 = vector.shape_cast %2 : vector<1x32x256xf32> to vector<32x256xf32>
    %cst = arith.constant dense<0.000000e+00> : vector<9x256xf32>
    %4 = tpu.matmul %0, %3, %cst {dimension_numbers = #tpu.dot_dimension_numbers<[1], [0], [0], [1], [0, 0, 1, 1], [], []>, precision = #tpu.contract_precision<fp32>} : vector<9x32xf32>, vector<32x256xf32>, vector<9x256xf32> -> vector<9x256xf32>
    %5 = vector.broadcast %1 : vector<9x1xf32> to vector<9x256xf32>
    %6 = arith.addf %4, %5 : vector<9x256xf32>
    %c0_6 = arith.constant 0 : index
    %c0_7 = arith.constant 0 : index
    %c0_8 = arith.constant 0 : index
    %7 = vector.load %arg5[%c0_6, %c0_7, %c0_8] : memref<1x9x256xf32, #tpu.memory_space<vmem>>, vector<1x9x256xf32>
    %8 = vector.shape_cast %7 : vector<1x9x256xf32> to vector<9x256xf32>
    %9 = vector.shape_cast %6 : vector<9x256xf32> to vector<1x9x256xf32>
    tpu.vector_store %arg5[%c0_6, %c0_7, %c0_8], %9 {strides = array<i32>} : memref<1x9x256xf32, #tpu.memory_space<vmem>>, vector<1x9x256xf32>,
    return
  }
  func.func @transform_0(%arg0: i32, %arg1: i32) -> (i32, i32, i32) {
    %c0_i32 = arith.constant 0 : i32
    %c0_i32_0 = arith.constant 0 : i32
    return %arg0, %c0_i32, %arg1 : i32, i32, i32
  }
  func.func @transform_1(%arg0: i32, %arg1: i32) -> (i32, i32) {
    %c0_i32 = arith.constant 0 : i32
    %c0_i32_0 = arith.constant 0 : i32
    %c0_i32_1 = arith.constant 0 : i32
    return %c0_i32, %c0_i32_0 : i32, i32
  }
  func.func @transform_2(%arg0: i32, %arg1: i32) -> (i32, i32) {
    %c0_i32 = arith.constant 0 : i32
    %c0_i32_0 = arith.constant 0 : i32
    %c0_i32_1 = arith.constant 0 : i32
    return %c0_i32, %c0_i32_0 : i32, i32
  }
  func.func @transform_3(%arg0: i32, %arg1: i32) -> (i32, i32, i32) {
    %c0_i32 = arith.constant 0 : i32
    %c0_i32_0 = arith.constant 0 : i32
    return %arg0, %c0_i32, %arg1 : i32, i32, i32
  }
}

</mosaic_0001>

<bundles_post_ra>
// kernel: tpu_custom_call.1
= control target key start
LH: loop header
LB: loop body
LE: loop exit
PB: predicated region body
PF: predicated region fallthrough
CT: control target
= control target key end

     0   :  { %8 = vsyncpa [#allocation3], 0  ;;  %s1420_s0 = inlined_call_operand.hbm [shape: f32[2,32,256], index: 0, kind: input, shape index: {}]   ;;  %s1421_s1 = inlined_call_operand.vmem [shape: f32[9,32], index: 1, kind: input, shape index: {}]   ;;  %s1422_s2 = inlined_call_operand.vmem [shape: f32[9,1], index: 2, kind: input, shape index: {}]   ;;  %s1423_s3 = inlined_call_operand.vmem [shape: f32[2,9,256], index: 3, kind: output, shape index: {}]  }
   0x1   :  { %10 = vsyncpa [#allocation3 + $0x1], 0  ;;  %s1193_s12 = smov 0   ;;  %s1195_s13 = smov 0  }
   0x2   :  { %s1197_s14 = smov 0   ;;  %s1199_s15 = smov 0  }
   0x3   :  { %s1201_s16 = smov 0   ;;  %s1203_s17 = smov 0  }
   0x4 LB: > { %s939_s18 = sadd.s32 4294967295, %s1166_s17   ;;  %s28_s19 = sadd.s32 1, %s1162_s16  ;;  %s1166_s17 = sphi %s1203_s17, %s16_s17   ;;  %s1162_s16 = sphi %s1201_s16, %s1431_s16   ;;  %s1158_s15 = sphi %s1199_s15, %s1430_s15   ;;  %s1154_s14 = sphi %s1197_s14, %s1429_s14   ;;  %s1150_s13 = sphi %s1195_s13, %s1428_s13   ;;  %s1146_s12 = sphi %s1193_s12, %s1427_s12  }
   0x5   : > { %p30_p0 = scmp.ge.s32.totalorder %s28_s19, 2  ;;  %s37_s20 = sadd.s32 1, %s1154_s14 }
   0x6   : > { %p44_p1 = scmp.ne.s32.totalorder %s1154_s14, %s1150_s13  ;;  %p45_p2 = scmp.eq.s32.totalorder %s1166_s17, 0 }
   0x7   : > { %s1433_s19 = smov (%p30_p0, %s28_s19), 0  ;;  %p50_p4 = scmp.ne.s32.totalorder %s1150_s13, %s1146_s12 }
   0x8   : > { %p1229_p3 = por %p45_p2, %p44_p1  ;;  %s32_s22 = ssub.s32 %s1162_s16, %s1433_s19 }
   0x9   : > { %p51_p5 = scmp.eq.s32.totalorder %s939_s18, 0  ;;  %p35_p6 = scmp.eq.s32.totalorder %s32_s22, 0 }
   0xa   : > { %p1032_p8 = scmp.lt.s32.totalorder %s1166_s17, 2  ;;  %s150_s25 = sand.u32 1, %s1154_s14  }
   0xb   : > { %p1236_p7 = por %p51_p5, %p50_p4  ;;  %s952_s26 = sshll.u32 %s1162_s16, 10 }
   0xc   : > { %s1242_s24 = scalar_select %p35_p6, %s1154_s14, %s37_s20  }
   0xd   : > { %s943_s27 = sshll.u32 %s150_s25, 6  ;;  %s1249_s30 = scalar_lea.hbm %s1420_s0, %s952_s26 }
   0xe   : > { %s154_s4 = scalar_lea.vmem [#allocation2], %s943_s27  ;;  %p1253_p9 = pnand %p1032_p8, %p1229_p3 }
   0xf   : > { %s163_s5 = sshll.u32 %s154_s4, 4  ;;  %s1259_s7 = scalar_lea.sflag [#allocation3], %s150_s25  ;;  %s1257_s5 = int_to_ptr.vmem [resolvable:$true] %s163_s5 }
  0x10   : > { %s1086_s8 = scalar_lea.hbm %s1249_s30, 1024  ;;  %p1088_p11 = pneg %p1253_p9 }
  0x11   : > { %p1087_p10 = scmp.ne.s32.totalorder %s1249_s30, %s1086_s8  ;;  %s1091_s11 = scalar_lea.hbm %s1420_s0, 2048 }
  0x12   : > { %p1092_p0 = scmp.lt.u32.totalorder %s1249_s30, %s1420_s0  ;;  %p1093_p1 = scmp.lt.u32.totalorder %s1091_s11, %s1086_s8 }
  0x13   : > { %p1089_p12 = pnand %p1088_p11, %p1087_p10  ;;  %p1095_p3 = scmp.lt.u32.totalorder %s1086_s8, %s1249_s30 }
  0x14   : > { %p1094_p2 = por %p1093_p1, %p1092_p0 }
  0x15   : > { %p1090_p13 = pneg %p1089_p12 }
  0x16   : > { %p1096_p4 = por %p1095_p3, %p1094_p2 }
  0x18   : > { %p1097_p5 = pnand %p1096_p4, %p1090_p13 }
  0x1a   : > { %1100 = shalt.err (!%p1097_p5)
}
  0x1b   : > { %s1101_s20 = scalar_lea.vmem %s1257_s5, 1024  ;;  %s1168_s21 = smov [#allocation2]  }
  0x1c   : > { %p1102_p6 = scmp.ne.s32.totalorder %s1257_s5, %s1101_s20  ;;  %s1106_s22 = sshll.u32 %s1168_s21, 4  ;;  %s1107_s22 = int_to_ptr.vmem [resolvable:$false] %s1106_s22 }
  0x1d   : > { %s1108_s25 = scalar_lea.vmem %s1107_s22, 2048  ;;  %p1109_p12 = scmp.lt.s32.totalorder %s1257_s5, %s1107_s22 }
  0x1e   : > { %p1104_p8 = pnand %p1102_p6, %p1088_p11  ;;  %p1110_p0 = scmp.lt.s32.totalorder %s1108_s25, %s1101_s20 }
  0x20   : > { %p1105_p10 = pneg %p1104_p8  ;;  %p1111_p1 = por %p1110_p0, %p1109_p12 }
  0x22   : > { %p1112_p2 = pnand %p1111_p1, %p1105_p10 }
  0x24   : > { %1115 = shalt.err (!%p1112_p2)
}
  0x25   : > { %s1169_s26 = smov 256   ;;  %s1170_s27 = smov 16  }
  0x26   : > { %1031 = dma.hbm_to_vmem [thread:$0]  (!%p1253_p9), %s1249_s30, 1024, %s1257_s5, %s1259_s7, %s1169_s26, %s1169_s26, %s1170_s27  }
  0x27   : > { %p946_p11 = scmp.ge.s32.totalorder %s1166_s17, 1  ;;  %p171_p13 = scmp.lt.s32.totalorder %s1166_s17, 3 }
  0x29   : > { %p172_p3 = pnand %p946_p11, %p171_p13 }
  0x2a   : > { %s177_s28 = sand.u32 (!%p172_p3), 1, %s1150_s13  }
  0x2b   : > { %175 = sbr.rel (%p172_p3) target bundleno = 306 (0x132), region = 32  ;;  %s947_s29 = sshll.u32 (!%p172_p3), %s177_s28, 6 }
  0x2c   : > { %s178_s4 = scalar_lea.sflag (!%p172_p3), [#allocation3], %s177_s28  ;;  %s181_s8 = scalar_lea.vmem (!%p172_p3), [#allocation2], %s947_s29 }
  0x32   : > { %1141 = dma.done.wait (%p1236_p7), %s178_s4, 1024  }
  0x33   : > { %1143 = vsyncadd (%p1236_p7), %s178_s4, 4294966272  ;;  %v1171_v0 = vmov 0.0   ;;  %v1172_v1 = vmov 0   ;;  %v224_v2 = vld [vmem:[%s181_s8 + $0x8] sm:$0xff]  ;;  %v226_v3 = vld [vmem:[%s181_s8 + $0x18] sm:$0xff]  ;;  %vm241_vm0 = vcmask 261120  }
  0x34   : > { %320 = vmatprep.mubr.f32.mxu1 %v1171_v0  ;;  %631 = vmatprep.mubr.f32.mxu0 %v1171_v0  ;;  %v223_v4 = vld [vmem:[%s181_s8] sm:$0xff]  ;;  %v248_v5 = vand.u32 4294901760, %v224_v2  ;;  %v252_v6 = vand.u32 4294901760, %v226_v3  ;;  %v225_v7 = vld [vmem:[%s181_s8 + $0x10] sm:$0xff]  ;;  %v228_v9 = vld [vmem:[%s181_s8 + $0x28] sm:$0xff]  ;;  %p210_p7 = scmp.lt.s32.totalorder %s1158_s15, 1 }
  0x35   : > { %1085 = vset.pattern.permute.xlu0 %v1172_v1  ;;  %v250_v8 = vand.u32 4294901760, %v223_v4  ;;  %v230_v10 = vld [vmem:[%s181_s8 + $0x38] sm:$0xff]  ;;  %v254_v11 = vand.u32 4294901760, %v225_v7  ;;  %v256_v12 = vand.u32 4294901760, %v228_v9  ;;  %v227_v14 = vld [vmem:[%s181_s8 + $0x20] sm:$0xff]  ;;  %v229_v15 = vld [vmem:[%s181_s8 + $0x30] sm:$0xff] }
  0x36   : > { %v260_v13 = vand.u32 4294901760, %v230_v10  ;;  %v219_v16 = vld [vmem:[%s1421_s1] sm:$0xff]  ;;  %v1299_v17 = vpack.c.bf16 %v252_v6, %v248_v5  ;;  %v1301_v18 = vsub.f32 %v224_v2, %v248_v5  ;;  %v1303_v19 = vsub.f32 %v226_v3, %v252_v6  ;;  %v222_v30 = vld [vmem:[%s1422_s2 + $0x8] sm:$0x1]  ;;  %s1435_s15 = smov (!%p210_p7, %s1158_s15), 1 }
  0x37   : > { %v1305_v20 = vsub.f32 %v223_v4, %v250_v8  ;;  %v221_v21 = vld [vmem:[%s1422_s2] sm:$0xff]  ;;  %v1310_v22 = vpack.c.bf16 %v254_v11, %v250_v8  ;;  %v1312_v23 = vsub.f32 %v225_v7, %v254_v11  ;;  %v1316_v25 = vsub.f32 %v228_v9, %v256_v12  ;;  %v220_v35 = vld [vmem:[%s1421_s1 + $0x8] sm:$0x1]  ;;  %s953_s12 = sshll.u32 %s1435_s15, 5 }
  0x38   : > { %v1314_v24 = vpack.c.bf16 %v260_v13, %v256_v12  ;;  %233 = vperm.xlu0 %1085, %v221_v21   ;;  %955 = vmatprep.subr.bf16.mxu1 %v1299_v17  ;;  %v1320_v26 = vsub.f32 %v230_v10, %v260_v13  ;;  %v258_v27 = vand.u32 4294901760, %v227_v14  ;;  %v262_v28 = vand.u32 4294901760, %v229_v15  ;;  %s217_s21 = scalar_lea.vmem %s1423_s3, %s953_s12 }
  0x39   : > { %979 = vmatprep.subr.bf16.mxu0 %v1299_v17  ;;  %v243_v29 = vsel %vm241_vm0, %v219_v16, 0  ;;  %957 = vmatpush1.bf16.msra.mxu1 %v1310_v22  ;;  %v345_v32 = vand.u32 4294901760, %v1301_v18  ;;  %v357_v33 = vand.u32 4294901760, %v1303_v19  ;;  %v351_v34 = vand.u32 4294901760, %v1305_v20 }
  0x3a   : > { %981 = vmatpush1.bf16.msra.mxu0 %v1310_v22  ;;  %v1328_v31 = vand.u32 4294901760, %v243_v29  ;;  %959 = vmatprep.subr.bf16.mxu1 %v1314_v24  ;;  %v1338_v36 = vpack.c.bf16 %v262_v28, %v258_v27  ;;  %v1340_v37 = vsub.f32 %v227_v14, %v258_v27  ;;  %v1342_v38 = vsub.f32 %v229_v15, %v262_v28 }
  0x3b   : > { %983 = vmatprep.subr.bf16.mxu0 %v1314_v24  ;;  %v363_v39 = vand.u32 4294901760, %v1312_v23  ;;  %v346_v41 = vsub.f32 %v1301_v18, %v345_v32  ;;  %v358_v42 = vsub.f32 %v1303_v19, %v357_v33  ;;  %v986_v43 = vpack.c.bf16 %v357_v33, %v345_v32 }
  0x3c   : > { %v1346_v40 = vsub.f32 %v243_v29, %v1328_v31  ;;  %238 = vperm.xlu0 %1085, %v222_v30   ;;  %v352_v44 = vsub.f32 %v1305_v20, %v351_v34  ;;  %v246_v47 = vsel %vm241_vm0, %v220_v35, 0  ;;  %v369_v54 = vand.u32 4294901760, %v1316_v25 }
  0x3d   : > { %v364_v45 = vsub.f32 %v1312_v23, %v363_v39  ;;  %v988_v46 = vpack.c.bf16 %v363_v39, %v351_v34  ;;  %961 = vmatpush1.bf16.msra.mxu1 %v1338_v36  ;;  %v347_v49 = vand.u32 4294901760, %v346_v41  ;;  %v359_v50 = vand.u32 4294901760, %v358_v42 }
  0x3e   : > { %985 = vmatpush1.bf16.msra.mxu0 %v1338_v36  ;;  %v323_v48 = vand.u32 4294901760, %v1346_v40  ;;  %v1356_v51 = vand.u32 4294901760, %v246_v47  ;;  %v353_v52 = vand.u32 4294901760, %v352_v44  ;;  %v381_v55 = vand.u32 4294901760, %v1320_v26 }
  0x3f   : > { %987 = vmatprep.subr.bf16.mxu0 %v986_v43  ;;  %v365_v53 = vand.u32 4294901760, %v364_v45  ;;  %v962_v57 = vpack.c.bf16 %v359_v50, %v347_v49  ;;  %v375_v59 = vand.u32 4294901760, %v1340_v37  ;;  %v370_v61 = vsub.f32 %v1316_v25, %v369_v54 }
  0x40   : > { %v324_v56 = vsub.f32 %v1346_v40, %v323_v48  ;;  %v333_v58 = vsub.f32 %v246_v47, %v1356_v51  ;;  %v382_v62 = vsub.f32 %v1320_v26, %v381_v55  ;;  %v990_v63 = vpack.c.bf16 %v381_v55, %v369_v54 }
  0x41   : > { %635 = vmatmul.mubr.f32.vlgmr.msra.gmra.mrb[0].mxu0 %v323_v48  ;;  %v964_v60 = vpack.c.bf16 %v365_v53, %v353_v52  ;;  %963 = vmatprep.subr.bf16.mxu1 %v962_v57  ;;  %v376_v3 = vsub.f32 %v1340_v37, %v375_v59  ;;  %v387_v4 = vand.u32 4294901760, %v1342_v38  ;;  %v371_v5 = vand.u32 4294901760, %v370_v61 }
  0x42   : > { %v325_v1 = vand.u32 4294901760, %v324_v56  ;;  %989 = vmatpush1.bf16.msra.mxu0 %v988_v46  ;;  %v334_v2 = vand.u32 4294901760, %v333_v58  ;;  %640 = vmatprep.mubr.f32.mxu0 %v1171_v0  ;;  %v383_v6 = vand.u32 4294901760, %v382_v62  ;;  %v970_v14 = vpack.c.bf16 %v1303_v19, %v1301_v18 }
  0x43   : > { %991 = vmatprep.subr.bf16.mxu0 %v990_v63  ;;  %v377_v8 = vand.u32 4294901760, %v376_v3  ;;  %v388_v9 = vsub.f32 %v1342_v38, %v387_v4  ;;  %v992_v10 = vpack.c.bf16 %v387_v4, %v375_v59  ;;  %v972_v16 = vpack.c.bf16 %v1312_v23, %v1305_v20 }
  0x44   : > { %326 = vmatmul.mubr.f32.vlgmr.msra.gmra.mrb[0].mxu1 %v325_v1  ;;  %v335_v7 = vsub.f32 %v333_v58, %v334_v2  ;;  %v966_v11 = vpack.c.bf16 %v383_v6, %v371_v5  ;;  %v974_v18 = vpack.c.bf16 %v1320_v26, %v1316_v25 }
  0x45   : > { %965 = vmatpush1.bf16.msra.mxu1 %v964_v60  ;;  %331 = vmatprep.mubr.f32.mxu1 %v1171_v0  ;;  %v389_v13 = vand.u32 4294901760, %v388_v9 }
  0x46   : > { %v336_v12 = vand.u32 4294901760, %v335_v7  ;;  %644 = vmatmul.mubr.f32.gmra.mrb[2].mxu0 %v334_v2  ;;  %967 = vmatprep.subr.bf16.mxu1 %v966_v11 }
  0x47   : > { %993 = vmatpush1.bf16.msra.mxu0 %v992_v10  ;;  %v968_v15 = vpack.c.bf16 %v389_v13, %v377_v8  ;;  %738 = vmatprep.mubr.f32.mxu0 %v1171_v0 }
  0x48   : > { %337 = vmatmul.mubr.f32.gmra.mrb[2].mxu1 %v336_v12  ;;  %995 = vmatprep.subr.bf16.mxu0 %v1299_v17  ;;  %v976_v17 = vpack.c.bf16 %v1342_v38, %v1340_v37 }
  0x49   : > { %447 = vmatprep.mubr.f32.mxu1 %v1171_v0  ;;  %969 = vmatpush1.bf16.msra.mxu1 %v968_v15 }
  0x4a   : > { %740 = vmatmul.mubr.f32.vlgmr.msra.gmra.mrb[0].mxu0 %v1328_v31  ;;  %971 = vmatprep.subr.bf16.mxu1 %v970_v14 }
  0x4b   : > { %997 = vmatpush1.bf16.msra.mxu0 %v1310_v22  ;;  %745 = vmatprep.mubr.f32.mxu0 %v1171_v0 }
  0x4c   : > { %999 = vmatprep.subr.bf16.mxu0 %v1314_v24  ;;  %449 = vmatmul.mubr.f32.vlgmr.msra.gmra.mrb[0].mxu1 %v1328_v31 }
  0x4d   : > { %973 = vmatpush1.bf16.msra.mxu1 %v972_v16  ;;  %454 = vmatprep.mubr.f32.mxu1 %v1171_v0 }
  0x4e   : > { %975 = vmatprep.subr.bf16.mxu1 %v974_v18  ;;  %747 = vmatmul.mubr.f32.gmra.mrb[2].mxu0 %v1356_v51 }
  0x4f   : > { %1001 = vmatpush1.bf16.msra.mxu0 %v1338_v36  ;;  %825 = vmatprep.mubr.f32.mxu0 %v1171_v0 }
  0x50   : > { %456 = vmatmul.mubr.f32.gmra.mrb[2].mxu1 %v1356_v51 }
  0x51   : > { %977 = vmatpush1.bf16.msra.mxu1 %v976_v17  ;;  %542 = vmatprep.mubr.f32.mxu1 %v1171_v0 }
  0x52   : > { %827 = vmatmul.mubr.f32.vlgmr.msra.gmra.mrb[0].mxu0 %v1328_v31 }
  0x53   : > { %832 = vmatprep.mubr.f32.mxu0 %v1171_v0 }
  0x54   : > { %545 = vmatmul.mubr.f32.vlgmr.msra.gmra.mrb[0].mxu1 %v1346_v40 }
  0x55   : > { %550 = vmatprep.mubr.f32.mxu1 %v1171_v0 }
  0x56   : > { %834 = vmatmul.mubr.f32.gmra.mrb[2].mxu0 %v1356_v51 }
  0x58   : > { %553 = vmatmul.mubr.f32.gmra.mrb[2].mxu1 %v333_v58 }
  0xb7   : > { %v234_v19 = vpop.permute.xlu0 %233 }
  0xbb   : > { %v239_v29 = vpop.permute.xlu0 %238 }
 0x125   : > { %v828_v20 = vpop.f32.mrb[0].mxu0 }
 0x126   : > { %v830_v21 = vpop.f32.mrb[1].mxu0 }
 0x127   : > { %v546_v22 = vpop.f32.mrb[0].mxu1 }
 0x128   : > { %v1002_v23 = vadd.f32 %v546_v22, %v234_v19  ;;  %v548_v24 = vpop.f32.mrb[1].mxu1 }
 0x129   : > { %v1004_v25 = vadd.f32 %v548_v24, %v234_v19  ;;  %v835_v26 = vpop.f32.mrb[2].mxu0 }
 0x12a   : > { %v1003_v27 = vadd.f32 %v1002_v23, %v828_v20  ;;  %v837_v0 = vpop.f32.mrb[3].mxu0 }
 0x12b   : > { %v1005_v28 = vadd.f32 %v1004_v25, %v830_v21  ;;  %v554_v30 = vpop.f32.mrb[2].mxu1 }
 0x12c   : > { %840 = vst [vmem:[%s217_s21] sm:$0xff] %v1003_v27  ;;  %v1006_v31 = vadd.f32 %v554_v30, %v239_v29  ;;  %v556_v32 = vpop.f32.mrb[3].mxu1 }
 0x12d   : > { %841 = vst [vmem:[%s217_s21 + $0x8] sm:$0xff] %v1005_v28  ;;  %v1008_v33 = vadd.f32 %v556_v32, %v239_v29 }
 0x12e   : > { %v1007_v34 = vadd.f32 %v1006_v31, %v835_v26 }
 0x12f   : > { %v1009_v35 = vadd.f32 %v1008_v33, %v837_v0 }
 0x130   : > { %842 = vst [vmem:[%s217_s21 + $0x10] sm:$0x1] %v1007_v34 }
 0x131   : > { %843 = vst [vmem:[%s217_s21 + $0x18] sm:$0x1] %v1009_v35 }
 0x132 PF: > { %s16_s17 = sadd.s32 1, %s1166_s17   ;;  %s1427_s12 = smov %s1150_s13 }
 0x133   : > { %p13_p9 = scmp.ge.s32.totalorder %s16_s17, 4   ;;  %s1428_s13 = smov %s1154_s14 }
 0x134   : > { %s1429_s14 = smov %s1242_s24  ;;  %s1430_s15 = smov %s1162_s16 }
 0x135   : > { %s1431_s16 = smov %s1433_s19  ;;  %15 = sbr.rel (!%p13_p9) target bundleno = 4 (0x4), region = 72 }
 0x13c   :  { %874 = vsyncpa [#allocation3], 1 }
 0x13d   :  { %876 = vsyncpa [#allocation3 + $0x1], 1 }

</bundles_post_ra>
